<compile_context>
chip_gen: v7x
topology: tpu7x:2x2x1
jax: 0.10.0
libtpu: 0.0.40
codegen_flags: <defaults>
</compile_context>

<pallas_src>
import jax
import jax.numpy as jnp
from jax.experimental import pallas as pl
from jax.experimental.pallas import tpu as pltpu


def _round_up(x, m):
    return ((x + m - 1) // m) * m


def _pick_tile(n, max_tile):
    """Largest multiple of 128 <= max_tile that divides n (n is a multiple of 128)."""
    t = max(128, (min(max_tile, n) // 128) * 128)
    while n % t != 0:
        t -= 128
    return t


def _vmem_capacity_bytes():
    """Per-TensorCore VMEM capacity; conservative fallback = 64 MiB (v7x)."""
    try:
        cap = int(pltpu.get_tpu_info().vmem_capacity_bytes)
        if cap > 0:
            return cap
    except Exception:
        pass
    return 64 * 1024 * 1024


def _vmem_budget():
    cap = _vmem_capacity_bytes()
    # Leave headroom: ~48 MiB usable on v7x (64 MiB), ~108 MiB on v5e/v6e (128 MiB).
    return min(cap - (16 << 20), int(cap * 0.85))


# ----------------------------- Pallas kernels -------------------------------


def _xw_kernel(x_ref, w_ref, o_ref):
    """S = X @ W  (bf16 inputs, f32 MXU accumulation, bf16 output)."""
    o_ref[...] = jnp.dot(
        x_ref[...], w_ref[...], preferred_element_type=jnp.float32
    ).astype(o_ref.dtype)


def xw_matmul(x, w, *, tm):
    """Row-tiled X @ W. x: (N_pad, d_in_pad) bf16, w: (d_in_pad, d_out_pad) bf16."""
    n_pad, d_in_pad = x.shape
    d_out_pad = w.shape[1]
    grid_m = n_pad // tm

    need = (2 * tm * d_in_pad * 2          # x tiles (double-buffered)
            + 2 * d_in_pad * d_out_pad * 2  # W (constant block; budget 2x)
            + 2 * tm * d_out_pad * 2)       # out tiles (double-buffered)
    budget = _vmem_budget()
    vmem_limit = int(min(max(need + (2 << 20), 32 << 20), budget))

    cost = pl.CostEstimate(
        flops=2 * n_pad * d_in_pad * d_out_pad,
        transcendentals=0,
        bytes_accessed=x.size * 2 + w.size * 2 + n_pad * d_out_pad * 2,
    )
    return pl.pallas_call(
        _xw_kernel,
        out_shape=jax.ShapeDtypeStruct((n_pad, d_out_pad), jnp.bfloat16),
        grid_spec=pltpu.PrefetchScalarGridSpec(
            num_scalar_prefetch=0,
            grid=(grid_m,),
            in_specs=[
                pl.BlockSpec((tm, d_in_pad), lambda i: (i, 0)),
                pl.BlockSpec((d_in_pad, d_out_pad), lambda i: (0, 0)),
            ],
            out_specs=pl.BlockSpec((tm, d_out_pad), lambda i: (i, 0)),
        ),
        compiler_params=pltpu.CompilerParams(
            dimension_semantics=("parallel",),
            vmem_limit_bytes=vmem_limit,
        ),
        cost_estimate=cost,
    )(x, w)


def _make_agg_kernel_resident(tk):
    """relu(A_hat @ S + b) with S fully VMEM-resident; slice S rows by k."""
    def kernel(a_ref, s_ref, b_ref, o_ref, acc_ref):
        k = pl.program_id(1)
        k0 = pl.multiple_of(k * tk, tk)
        prod = jnp.dot(
            a_ref[...], s_ref[pl.ds(k0, tk), :],
            preferred_element_type=jnp.float32,
        )

        @pl.when(k == 0)
        def _():
            acc_ref[...] = prod

        @pl.when(k > 0)
        def _():
            acc_ref[...] += prod

        @pl.when(k == pl.num_programs(1) - 1)
        def _():
            o_ref[...] = jnp.maximum(acc_ref[...] + b_ref[...], 0.0).astype(o_ref.dtype)

    return kernel


def _agg_kernel_tiled(a_ref, s_ref, b_ref, o_ref, acc_ref):
    """Fallback: S streamed as (tk, d_out) row panels."""
    k = pl.program_id(1)
    prod = jnp.dot(a_ref[...], s_ref[...], preferred_element_type=jnp.float32)

    @pl.when(k == 0)
    def _():
        acc_ref[...] = prod

    @pl.when(k > 0)
    def _():
        acc_ref[...] += prod

    @pl.when(k == pl.num_programs(1) - 1)
    def _():
        o_ref[...] = jnp.maximum(acc_ref[...] + b_ref[...], 0.0).astype(o_ref.dtype)


def gcn_aggregate(a_hat, s, b, *, tm, tk):
    """relu(A_hat @ S + b).  a_hat: (N_pad, N_pad) bf16, s: (N_pad, d_out_pad) bf16,
    b: (1, d_out_pad) f32."""
    n_pad = a_hat.shape[0]
    d_out_pad = s.shape[1]
    grid = (n_pad // tm, n_pad // tk)

    budget = _vmem_budget()
    # Conservative VMEM accounting (assume double-buffering everywhere).
    a_bytes = 2 * tm * tk * 2
    b_bytes = 2 * d_out_pad * 4
    o_bytes = 2 * tm * d_out_pad * 2
    acc_bytes = tm * d_out_pad * 4
    fixed = a_bytes + b_bytes + o_bytes + acc_bytes
    margin = 2 << 20
    s_resident_bytes = 2 * n_pad * d_out_pad * 2
    s_resident = (fixed + s_resident_bytes + margin) <= budget

    if s_resident:
        s_spec = pl.BlockSpec((n_pad, d_out_pad), lambda i, k: (0, 0))
        kernel = _make_agg_kernel_resident(tk)
        s_stream_bytes = n_pad * d_out_pad * 2
        need = fixed + s_resident_bytes + margin
    else:
        s_spec = pl.BlockSpec((tk, d_out_pad), lambda i, k: (k, 0))
        kernel = _agg_kernel_tiled
        s_stream_bytes = (n_pad // tm) * n_pad * d_out_pad * 2
        need = fixed + 2 * tk * d_out_pad * 2 + margin

    vmem_limit = int(min(max(need, 32 << 20), budget))

    cost = pl.CostEstimate(
        flops=2 * n_pad * n_pad * d_out_pad,
        transcendentals=0,
        bytes_accessed=a_hat.size * 2 + s_stream_bytes + b.size * 4
        + n_pad * d_out_pad * 2,
    )
    return pl.pallas_call(
        kernel,
        out_shape=jax.ShapeDtypeStruct((n_pad, d_out_pad), jnp.bfloat16),
        grid_spec=pltpu.PrefetchScalarGridSpec(
            num_scalar_prefetch=0,
            grid=grid,
            in_specs=[
                pl.BlockSpec((tm, tk), lambda i, k: (i, k)),    # A_hat tile
                s_spec,                                         # S (resident or panel)
                pl.BlockSpec((1, d_out_pad), lambda i, k: (0, 0)),  # bias
            ],
            out_specs=pl.BlockSpec((tm, d_out_pad), lambda i, k: (i, 0)),
            scratch_shapes=[pltpu.VMEM((tm, d_out_pad), jnp.float32)],
        ),
        compiler_params=pltpu.CompilerParams(
            dimension_semantics=("parallel", "arbitrary"),
            vmem_limit_bytes=vmem_limit,
        ),
        cost_estimate=cost,
    )(a_hat, s, b)


# --------------------------------- JAX glue ----------------------------------


def build_norm_adj_padded(edge_index, edge_weight, num_nodes, n_pad,
                          dtype=jnp.bfloat16):
    """GCN normalization A_hat = D^-1/2 (A + I) D^-1/2 built directly at the
    padded size and cast immediately (single N^2 f32 materialization).

    Self loops follow PyG add_remaining_self_loops: only added where missing.
    Padded rows/cols have zero degree -> zero rows/cols in A_hat.
    """
    src = edge_index[0]
    dst = edge_index[1]
    if edge_weight is None:
        edge_weight = jnp.ones(src.shape[0], dtype=jnp.float32)
    adj = jnp.zeros((n_pad, n_pad), jnp.float32)
    adj = adj.at[dst, src].add(edge_weight.astype(jnp.float32))
    idx = jnp.arange(num_nodes)
    diag = adj[idx, idx]
    adj = adj.at[idx, idx].set(jnp.where(diag == 0.0, 1.0, diag))
    deg = adj.sum(axis=1)
    d_inv_sqrt = jnp.where(deg > 0.0, jax.lax.rsqrt(deg), 0.0)
    a_hat = d_inv_sqrt[:, None] * adj * d_inv_sqrt[None, :]
    return a_hat.astype(dtype)


class ExtractorPallas:
    """GCN-stack Extractor: x <- relu(GCNConv_i(x, edge_idx, edge_weight))."""

    def __init__(self, layer_unit_count_list, key):
        self.layer_unit_count_list = layer_unit_count_list
        self.layer_count = len(layer_unit_count_list) - 1
        self.weights = []       # padded (d_in_pad, d_out_pad) bf16
        self.biases = []        # padded (1, d_out_pad) f32
        self.ref_weights = []   # unpadded f32 (for the pure-JAX reference)
        self.ref_biases = []
        self.dims = []
        for i in range(self.layer_count):
            d_in = layer_unit_count_list[i]
            d_out = layer_unit_count_list[i + 1]
            d_in_p = _round_up(d_in, 128)
            d_out_p = _round_up(d_out, 128)
            key, wk, bk = jax.random.split(key, 3)
            scale = jnp.sqrt(2.0 / (d_in + d_out)).astype(jnp.float32)
            w = jax.random.normal(wk, (d_in, d_out), jnp.float32) * scale
            b = jax.random.normal(bk, (d_out,), jnp.float32) * 0.01
            w_pad = jnp.zeros((d_in_p, d_out_p), jnp.float32).at[:d_in, :d_out].set(w)
            b_pad = jnp.zeros((1, d_out_p), jnp.float32).at[0, :d_out].set(b)
            self.weights.append(w_pad.astype(jnp.bfloat16))
            self.biases.append(b_pad)
            self.ref_weights.append(w)
            self.ref_biases.append(b)
            self.dims.append((d_in, d_out, d_in_p, d_out_p))

    def __call__(self, x, edge_index, edge_weight=None):
        num_nodes, feat = x.shape
        n_pad = _round_up(num_nodes, 128)
        tm = _pick_tile(n_pad, 512)        # aggregation row tile
        tk = _pick_tile(n_pad, 512)        # aggregation reduction tile
        tm_xw = _pick_tile(n_pad, 1024)    # XW row tile (W is a constant block)

        # Normalized adjacency, built once at padded size, bf16, reused by all layers.
        a_bf16 = build_norm_adj_padded(edge_index, edge_weight, num_nodes, n_pad)

        # Pad node features to (n_pad, d_in_pad) lane-dense layout.
        d_in_p0 = self.dims[0][2]
        h = jnp.zeros((n_pad, d_in_p0), jnp.bfloat16)
        h = h.at[:num_nodes, :feat].set(x.astype(jnp.bfloat16))

        for i in range(self.layer_count):
            s = xw_matmul(h, self.weights[i], tm=tm_xw)        # X @ W once per layer
            h = gcn_aggregate(a_bf16, s, self.biases[i], tm=tm, tk=tk)

        d_out_last = self.layer_unit_count_list[-1]
        return h[:num_nodes, :d_out_last].astype(jnp.float32)


def gcn_reference(x, edge_index, edge_weight, weights, biases):
    """Pure-JAX f32 reference of the same dense GCN formulation."""
    n = x.shape[0]
    src, dst = edge_index[0], edge_index[1]
    if edge_weight is None:
        edge_weight = jnp.ones(src.shape[0], jnp.float32)
    adj = jnp.zeros((n, n), jnp.float32).at[dst, src].add(edge_weight)
    idx = jnp.arange(n)
    diag = adj[idx, idx]
    adj = adj.at[idx, idx].set(jnp.where(diag == 0.0, 1.0, diag))
    deg = adj.sum(axis=1)
    dis = jnp.where(deg > 0.0, 1.0 / jnp.sqrt(deg), 0.0)
    a_hat = dis[:, None] * adj * dis[None, :]
    h = x
    for w, b in zip(weights, biases):
        h = jnp.maximum(a_hat @ (h @ w) + b[None, :], 0.0)
    return h


# ----------------------------------- main ------------------------------------


if __name__ == "__main__":
    key = jax.random.PRNGKey(0)
    k_model, k_x, k_w = jax.random.split(key, 3)

    # 1000 nodes pads to 1024 -> aggregation grid (2, 2) with 512x512 tiles and a
    # VMEM-resident S panel, so both the accumulation and the padding paths run.
    num_nodes = 1000
    layer_unit_count_list = [32, 64, 32]   # feature dims padded to 128 internally

    x = jax.random.normal(k_x, (num_nodes, layer_unit_count_list[0]), jnp.float32)

    # deterministic undirected ring graph: (i, i+1) and (i+1, i)
    src = jnp.arange(num_nodes, dtype=jnp.int32)
    dst = (src + 1) % num_nodes
    edge_index = jnp.stack(
        [jnp.concatenate([src, dst]), jnp.concatenate([dst, src])], axis=0
    )
    edge_weight = jax.random.uniform(
        k_w, (edge_index.shape[1],), jnp.float32, minval=0.5, maxval=1.5
    )

    model = ExtractorPallas(layer_unit_count_list, k_model)
    out = jax.block_until_ready(model(x, edge_index, edge_weight))

    assert out.shape == (num_nodes, layer_unit_count_list[-1])
    assert bool(jnp.all(out >= 0.0))          # ReLU output is non-negative
    assert bool(jnp.all(jnp.isfinite(out)))

    ref = gcn_reference(x, edge_index, edge_weight,
                        model.ref_weights, model.ref_biases)
    max_err = float(jnp.max(jnp.abs(out - ref)))
    assert max_err < 0.1, f"max abs error vs f32 reference too large: {max_err}"

    print("KERNEL_OK")
</pallas_src>

<mosaic_0001>
module attributes {stable_mosaic.version = 11 : i64} {
  func.func @_xw_kernel(%arg0: i32, %arg1: memref<1024x128xbf16, #tpu.memory_space<vmem>>, %arg2: memref<128x128xbf16, #tpu.memory_space<vmem>>, %arg3: memref<1024x128xbf16, #tpu.memory_space<vmem>>) attributes {dimension_semantics = [#tpu.dimension_semantics<parallel>], iteration_bounds = array<i64: 1>, scalar_prefetch = 0 : i64, scratch_operands = 0 : i64, tpu.core_type = #tpu.core_type<tc>, window_params = [{transform_indices = @transform_0, window_bounds = array<i64: 1024, 128>}, {pipeline_mode = #tpu.pipeline_mode<synchronous>, transform_indices = @transform_1, window_bounds = array<i64: 128, 128>}, {transform_indices = @transform_2, window_bounds = array<i64: 1024, 128>}]} {
    %c0 = arith.constant 0 : index
    %c0_0 = arith.constant 0 : index
    %0 = vector.load %arg1[%c0, %c0_0] : memref<1024x128xbf16, #tpu.memory_space<vmem>>, vector<1024x128xbf16>
    %c0_1 = arith.constant 0 : index
    %c0_2 = arith.constant 0 : index
    %1 = vector.load %arg2[%c0_1, %c0_2] : memref<128x128xbf16, #tpu.memory_space<vmem>>, vector<128x128xbf16>
    %cst = arith.constant dense<0.000000e+00> : vector<1024x128xf32>
    %2 = tpu.matmul %0, %1, %cst {dimension_numbers = #tpu.dot_dimension_numbers<[1], [0], [0], [1], [0, 0, 1, 1], [], []>} : vector<1024x128xbf16>, vector<128x128xbf16>, vector<1024x128xf32> -> vector<1024x128xf32>
    %3 = arith.truncf %2 : vector<1024x128xf32> to vector<1024x128xbf16>
    %c0_3 = arith.constant 0 : index
    %c0_4 = arith.constant 0 : index
    %4 = vector.load %arg3[%c0_3, %c0_4] : memref<1024x128xbf16, #tpu.memory_space<vmem>>, vector<1024x128xbf16>
    tpu.vector_store %arg3[%c0_3, %c0_4], %3 {strides = array<i32>} : memref<1024x128xbf16, #tpu.memory_space<vmem>>, vector<1024x128xbf16>,
    return
  }
  func.func @transform_0(%arg0: i32) -> (i32, i32) {
    %c0_i32 = arith.constant 0 : i32
    %c0_i32_0 = arith.constant 0 : i32
    return %arg0, %c0_i32 : i32, i32
  }
  func.func @transform_1(%arg0: i32) -> (i32, i32) {
    %c0_i32 = arith.constant 0 : i32
    %c0_i32_0 = arith.constant 0 : i32
    %c0_i32_1 = arith.constant 0 : i32
    return %c0_i32, %c0_i32_0 : i32, i32
  }
  func.func @transform_2(%arg0: i32) -> (i32, i32) {
    %c0_i32 = arith.constant 0 : i32
    %c0_i32_0 = arith.constant 0 : i32
    return %arg0, %c0_i32 : i32, i32
  }
}

</mosaic_0001>

<bundles_post_ra>
// kernel: tpu_custom_call.1
= control target key start
LH: loop header
LB: loop body
LE: loop exit
PB: predicated region body
PF: predicated region fallthrough
CT: control target
= control target key end

     0   :  { %7 = vsyncpa [#allocation3], 0  ;;  %s2977_s0 = inlined_call_operand.hbm [shape: bf16[1024,128], index: 0, kind: input, shape index: {}]   ;;  %s2978_s1 = inlined_call_operand.hbm [shape: bf16[128,128], index: 1, kind: input, shape index: {}]   ;;  %s2979_s2 = inlined_call_operand.hbm [shape: bf16[1024,128], index: 2, kind: output, shape index: {}]  }
   0x1   :  { %8 = vsyncpa [#allocation6], 0 }
   0x2   :  { %9 = vsyncpa [#allocation4], 0  ;;  %s2912_s9 = smov [#allocation2]   ;;  %s2840_s13 = scalar_lea.hbm %s2977_s0, 8192 }
   0x3   :  { %s15_s10 = sshll.u32 %s2912_s9, 4  ;;  %p2841_p0 = scmp.ne.s32.totalorder %s2977_s0, %s2840_s13  ;;  %s16_s10 = int_to_ptr.vmem [resolvable:$true] %s15_s10 }
   0x4   :  { %p2844_p1 = scmp.lt.u32.totalorder %s2840_s13, %s2977_s0 }
   0x6   :  { %p2846_p2 = pnand %p2844_p1, %p2841_p0 }
   0x8   :  { %2849 = shalt.err (!%p2846_p2)
}
   0x9   :  { %s2850_s18 = scalar_lea.vmem %s16_s10, 8192  ;;  %p2855_p4 = scmp.lt.s32.totalorder %s16_s10, %s16_s10 }
   0xa   :  { %p2851_p3 = scmp.ne.s32.totalorder %s16_s10, %s2850_s18  ;;  %p2856_p5 = scmp.lt.s32.totalorder %s2850_s18, %s2850_s18 }
   0xc   :  { %p2857_p6 = por %p2856_p5, %p2855_p4 }
   0xe   :  { %p2858_p7 = pnand %p2857_p6, %p2851_p3 }
  0x10   :  { %2861 = shalt.err (!%p2858_p7)
}
  0x11   :  { %s2913_s19 = smov 64   ;;  %s2914_s20 = smov 4  }
  0x12   :  { %21 = dma.hbm_to_vmem [thread:$0]  %s2977_s0, 8192, %s16_s10, [#allocation3], %s2913_s19, %s2913_s19, %s2914_s20  }
  0x13   :  { %s2915_s23 = smov [#allocation5]   ;;  %s2862_s27 = scalar_lea.hbm %s2978_s1, 1024 }
  0x14   :  { %s27_s24 = sshll.u32 %s2915_s23, 4  ;;  %p2863_p8 = scmp.ne.s32.totalorder %s2978_s1, %s2862_s27  ;;  %s28_s24 = int_to_ptr.vmem [resolvable:$true] %s27_s24 }
  0x15   :  { %p2866_p9 = scmp.lt.u32.totalorder %s2862_s27, %s2978_s1 }
  0x17   :  { %p2868_p10 = pnand %p2866_p9, %p2863_p8 }
  0x19   :  { %2871 = shalt.err (!%p2868_p10)
}
  0x1a   :  { %s2872_s4 = scalar_lea.vmem %s28_s24, 1024  ;;  %p2877_p12 = scmp.lt.s32.totalorder %s28_s24, %s28_s24 }
  0x1b   :  { %p2873_p11 = scmp.ne.s32.totalorder %s28_s24, %s2872_s4  ;;  %p2878_p13 = scmp.lt.s32.totalorder %s2872_s4, %s2872_s4 }
  0x1d   :  { %p2879_p0 = por %p2878_p13, %p2877_p12 }
  0x1f   :  { %p2880_p1 = pnand %p2879_p0, %p2873_p11 }
  0x21   :  { %2883 = shalt.err (!%p2880_p1)
}
  0x22   :  { %33 = dma.hbm_to_vmem [thread:$0]  %s2978_s1, 1024, %s28_s24, [#allocation6], %s2913_s19, %s2913_s19, %s2914_s20  }
  0x23   :  { %2906 = dma.done.wait [#allocation3], 8192  }
  0x24   :  { %2907 = vsyncadd [#allocation3], 4294959104 }
  0x25   :  { %2908 = dma.done.wait [#allocation6], 1024  }
  0x26   :  { %2909 = vsyncadd [#allocation6], 4294966272  ;;  %v2768_v0 = vld [vmem:[#allocation5] sm:$0xff]   ;;  %v2769_v1 = vld [vmem:[#allocation5 + $0x8] sm:$0xff]   ;;  %s2916_s1 = smov [#allocation7]  }
  0x27   :  { %2603 = vmatprep.subr.bf16.mxu0 %v2768_v0  ;;  %2747 = vmatprep.subr.bf16.mxu1 %v2768_v0  ;;  %v2770_v2 = vld [vmem:[#allocation5 + $0x10] sm:$0xff]   ;;  %v2771_v3 = vld [vmem:[#allocation5 + $0x18] sm:$0xff]   ;;  %v2776_v4 = vld [vmem:[#allocation2] sm:$0xff]   ;;  %s1807_s6 = sshll.u32 %s2916_s1, 4  ;;  %s1808_s6 = int_to_ptr.vmem [resolvable:$true] %s1807_s6 }
  0x28   :  { %2604 = vmatpush3.bf16.msra.mxu0 %v2768_v0  ;;  %2755 = vmatpush3.bf16.msra.mxu1 %v2768_v0  ;;  %v2777_v5 = vld [vmem:[#allocation2 + $0x100] sm:$0xff]   ;;  %v2773_v7 = vld [vmem:[#allocation5 + $0x28] sm:$0xff]   ;;  %v2774_v8 = vld [vmem:[#allocation5 + $0x30] sm:$0xff]   ;;  %s2884_s7 = scalar_lea.vmem %s1808_s6, 8192  ;;  %p2889_p3 = scmp.lt.s32.totalorder %s1808_s6, %s1808_s6 }
  0x29   :  { %2605 = vmatprep.subr.bf16.mxu0 %v2769_v1  ;;  %2748 = vmatprep.subr.bf16.mxu1 %v2769_v1  ;;  %v2772_v6 = vld [vmem:[#allocation5 + $0x20] sm:$0xff]   ;;  %v2775_v9 = vld [vmem:[#allocation5 + $0x38] sm:$0xff]   ;;  %v2778_v10 = vld [vmem:[#allocation2 + $0x8] sm:$0xff]   ;;  %p2885_p2 = scmp.ne.s32.totalorder %s1808_s6, %s2884_s7  ;;  %p2890_p4 = scmp.lt.s32.totalorder %s2884_s7, %s2884_s7 }
  0x2a   :  { %2619 = vmatprep.mubr.bf16.mxu0 %v2776_v4  ;;  %2683 = vmatprep.mubr.bf16.mxu1 %v2777_v5  ;;  %v2779_v11 = vld [vmem:[#allocation2 + $0x108] sm:$0xff]   ;;  %v2780_v12 = vld [vmem:[#allocation2 + $0x10] sm:$0xff]   ;;  %v2782_v14 = vld [vmem:[#allocation2 + $0x18] sm:$0xff]  }
  0x2b   :  { %v2781_v13 = vld [vmem:[#allocation2 + $0x110] sm:$0xff]   ;;  %v2783_v15 = vld [vmem:[#allocation2 + $0x118] sm:$0xff]   ;;  %v2784_v16 = vld [vmem:[#allocation2 + $0x20] sm:$0xff]   ;;  %p2891_p5 = por %p2890_p4, %p2889_p3 }
  0x2c   :  { %2606 = vmatpush3.bf16.msra.mxu0 %v2769_v1  ;;  %2756 = vmatpush3.bf16.msra.mxu1 %v2769_v1  ;;  %v2785_v17 = vld [vmem:[#allocation2 + $0x120] sm:$0xff]   ;;  %v2786_v18 = vld [vmem:[#allocation2 + $0x28] sm:$0xff]   ;;  %v2788_v20 = vld [vmem:[#allocation2 + $0x30] sm:$0xff]  }
  0x2d   :  { %2607 = vmatprep.subr.bf16.mxu0 %v2770_v2  ;;  %2749 = vmatprep.subr.bf16.mxu1 %v2770_v2  ;;  %v2787_v19 = vld [vmem:[#allocation2 + $0x128] sm:$0xff]   ;;  %v2789_v21 = vld [vmem:[#allocation2 + $0x130] sm:$0xff]   ;;  %v2790_v22 = vld [vmem:[#allocation2 + $0x38] sm:$0xff]   ;;  %p2892_p6 = pnand %p2891_p5, %p2885_p2 }
  0x2e   :  { %v2791_v23 = vld [vmem:[#allocation2 + $0x138] sm:$0xff]   ;;  %v2792_v24 = vld [vmem:[#allocation2 + $0x40] sm:$0xff]   ;;  %v2794_v26 = vld [vmem:[#allocation2 + $0x48] sm:$0xff]  }
  0x2f   :  { %v2793_v25 = vld [vmem:[#allocation2 + $0x140] sm:$0xff]   ;;  %v2795_v27 = vld [vmem:[#allocation2 + $0x148] sm:$0xff]   ;;  %v2796_v28 = vld [vmem:[#allocation2 + $0x50] sm:$0xff]  }
  0x30   :  { %2608 = vmatpush3.bf16.msra.mxu0 %v2770_v2  ;;  %2757 = vmatpush3.bf16.msra.mxu1 %v2770_v2  ;;  %v2797_v29 = vld [vmem:[#allocation2 + $0x150] sm:$0xff]   ;;  %v2798_v30 = vld [vmem:[#allocation2 + $0x58] sm:$0xff]   ;;  %v2800_v32 = vld [vmem:[#allocation2 + $0x60] sm:$0xff]  }
  0x31   :  { %2609 = vmatprep.subr.bf16.mxu0 %v2771_v3  ;;  %2750 = vmatprep.subr.bf16.mxu1 %v2771_v3  ;;  %v2799_v31 = vld [vmem:[#allocation2 + $0x158] sm:$0xff]   ;;  %v2801_v33 = vld [vmem:[#allocation2 + $0x160] sm:$0xff]   ;;  %v2802_v34 = vld [vmem:[#allocation2 + $0x68] sm:$0xff]  }
  0x32   :  { %v2803_v35 = vld [vmem:[#allocation2 + $0x168] sm:$0xff]   ;;  %v2804_v36 = vld [vmem:[#allocation2 + $0x70] sm:$0xff]   ;;  %v2806_v38 = vld [vmem:[#allocation2 + $0x78] sm:$0xff]  }
  0x33   :  { %v2805_v37 = vld [vmem:[#allocation2 + $0x170] sm:$0xff]   ;;  %v2807_v39 = vld [vmem:[#allocation2 + $0x178] sm:$0xff]   ;;  %v2808_v40 = vld [vmem:[#allocation2 + $0x80] sm:$0xff]  }
  0x34   :  { %2610 = vmatpush3.bf16.msra.mxu0 %v2771_v3  ;;  %2758 = vmatpush3.bf16.msra.mxu1 %v2771_v3  ;;  %v2809_v41 = vld [vmem:[#allocation2 + $0x180] sm:$0xff]   ;;  %v2810_v42 = vld [vmem:[#allocation2 + $0x88] sm:$0xff]   ;;  %v2812_v44 = vld [vmem:[#allocation2 + $0x90] sm:$0xff]  }
  0x35   :  { %2611 = vmatprep.subr.bf16.mxu0 %v2772_v6  ;;  %2751 = vmatprep.subr.bf16.mxu1 %v2772_v6  ;;  %v2811_v43 = vld [vmem:[#allocation2 + $0x188] sm:$0xff]   ;;  %v2813_v45 = vld [vmem:[#allocation2 + $0x190] sm:$0xff]   ;;  %v2814_v46 = vld [vmem:[#allocation2 + $0x98] sm:$0xff]  }
  0x36   :  { %v2815_v47 = vld [vmem:[#allocation2 + $0x198] sm:$0xff]   ;;  %v2816_v48 = vld [vmem:[#allocation2 + $0xa0] sm:$0xff]   ;;  %v2818_v50 = vld [vmem:[#allocation2 + $0xa8] sm:$0xff]  }
  0x37   :  { %v2817_v49 = vld [vmem:[#allocation2 + $0x1a0] sm:$0xff]   ;;  %v2819_v51 = vld [vmem:[#allocation2 + $0x1a8] sm:$0xff]   ;;  %v2820_v52 = vld [vmem:[#allocation2 + $0xb0] sm:$0xff]  }
  0x38   :  { %2612 = vmatpush3.bf16.msra.mxu0 %v2772_v6  ;;  %2759 = vmatpush3.bf16.msra.mxu1 %v2772_v6  ;;  %v2821_v53 = vld [vmem:[#allocation2 + $0x1b0] sm:$0xff]   ;;  %v2822_v54 = vld [vmem:[#allocation2 + $0xb8] sm:$0xff]   ;;  %v2824_v56 = vld [vmem:[#allocation2 + $0xc0] sm:$0xff]  }
  0x39   :  { %2613 = vmatprep.subr.bf16.mxu0 %v2773_v7  ;;  %2752 = vmatprep.subr.bf16.mxu1 %v2773_v7  ;;  %v2823_v55 = vld [vmem:[#allocation2 + $0x1b8] sm:$0xff]   ;;  %v2825_v57 = vld [vmem:[#allocation2 + $0x1c0] sm:$0xff]   ;;  %v2826_v58 = vld [vmem:[#allocation2 + $0xc8] sm:$0xff]  }
  0x3a   :  { %v2827_v59 = vld [vmem:[#allocation2 + $0x1c8] sm:$0xff]   ;;  %v2828_v60 = vld [vmem:[#allocation2 + $0xd0] sm:$0xff]   ;;  %v2830_v62 = vld [vmem:[#allocation2 + $0xd8] sm:$0xff]  }
  0x3b   :  { %v2829_v61 = vld [vmem:[#allocation2 + $0x1d0] sm:$0xff]   ;;  %v2831_v63 = vld [vmem:[#allocation2 + $0x1d8] sm:$0xff]   ;;  %v2832_v0 = vld [vmem:[#allocation2 + $0xe0] sm:$0xff]  }
  0x3c   :  { %2614 = vmatpush3.bf16.msra.mxu0 %v2773_v7  ;;  %2760 = vmatpush3.bf16.msra.mxu1 %v2773_v7  ;;  %v2833_v1 = vld [vmem:[#allocation2 + $0x1e0] sm:$0xff]   ;;  %v2834_v2 = vld [vmem:[#allocation2 + $0xe8] sm:$0xff]   ;;  %v2836_v4 = vld [vmem:[#allocation2 + $0xf0] sm:$0xff]  }
  0x3d   :  { %2615 = vmatprep.subr.bf16.mxu0 %v2774_v8  ;;  %2753 = vmatprep.subr.bf16.mxu1 %v2774_v8  ;;  %v2835_v3 = vld [vmem:[#allocation2 + $0x1e8] sm:$0xff]   ;;  %v2837_v5 = vld [vmem:[#allocation2 + $0x1f0] sm:$0xff]   ;;  %v2838_v6 = vld [vmem:[#allocation2 + $0xf8] sm:$0xff]  }
  0x3e   :  { %v2839_v7 = vld [vmem:[#allocation2 + $0x1f8] sm:$0xff]  }
  0x40   :  { %2616 = vmatpush3.bf16.msra.mxu0 %v2774_v8  ;;  %2761 = vmatpush3.bf16.msra.mxu1 %v2774_v8 }
  0x41   :  { %2617 = vmatprep.subr.bf16.mxu0 %v2775_v9  ;;  %2754 = vmatprep.subr.bf16.mxu1 %v2775_v9 }
  0x44   :  { %2618 = vmatpush3.bf16.msra.mxu0 %v2775_v9  ;;  %2762 = vmatpush3.bf16.msra.mxu1 %v2775_v9 }
  0x47   :  { %2620 = vmatmul.mubr.bf16.vlgmr.msra.gmra.mrb[0].mxu0 %v2778_v10  ;;  %2684 = vmatmul.mubr.bf16.vlgmr.msra.gmra.mrb[0].mxu1 %v2779_v11 }
  0x48   :  { %2623 = vmatprep.mubr.bf16.mxu0 %v2780_v12  ;;  %2687 = vmatprep.mubr.bf16.mxu1 %v2781_v13 }
  0x4f   :  { %2624 = vmatmul.mubr.bf16.gmra.mrb[4].mxu0 %v2782_v14  ;;  %2688 = vmatmul.mubr.bf16.gmra.mrb[4].mxu1 %v2783_v15 }
  0x50   :  { %2627 = vmatprep.mubr.bf16.mxu0 %v2784_v16  ;;  %2691 = vmatprep.mubr.bf16.mxu1 %v2785_v17 }
  0x57   :  { %2628 = vmatmul.mubr.bf16.gmra.mrb[8].mxu0 %v2786_v18  ;;  %2692 = vmatmul.mubr.bf16.gmra.mrb[8].mxu1 %v2787_v19 }
  0x58   :  { %2631 = vmatprep.mubr.bf16.mxu0 %v2788_v20  ;;  %2695 = vmatprep.mubr.bf16.mxu1 %v2789_v21 }
  0x5f   :  { %2632 = vmatmul.mubr.bf16.gmra.mrb[12].mxu0 %v2790_v22  ;;  %2696 = vmatmul.mubr.bf16.gmra.mrb[12].mxu1 %v2791_v23 }
  0x60   :  { %2635 = vmatprep.mubr.bf16.mxu0 %v2792_v24  ;;  %2699 = vmatprep.mubr.bf16.mxu1 %v2793_v25 }
  0x67   :  { %2636 = vmatmul.mubr.bf16.gmra.mrb[16].mxu0 %v2794_v26  ;;  %2700 = vmatmul.mubr.bf16.gmra.mrb[16].mxu1 %v2795_v27 }
  0x68   :  { %2639 = vmatprep.mubr.bf16.mxu0 %v2796_v28  ;;  %2703 = vmatprep.mubr.bf16.mxu1 %v2797_v29 }
  0x6f   :  { %2640 = vmatmul.mubr.bf16.gmra.mrb[20].mxu0 %v2798_v30  ;;  %2704 = vmatmul.mubr.bf16.gmra.mrb[20].mxu1 %v2799_v31 }
  0x70   :  { %2643 = vmatprep.mubr.bf16.mxu0 %v2800_v32  ;;  %2707 = vmatprep.mubr.bf16.mxu1 %v2801_v33 }
  0x77   :  { %2644 = vmatmul.mubr.bf16.gmra.mrb[24].mxu0 %v2802_v34  ;;  %2708 = vmatmul.mubr.bf16.gmra.mrb[24].mxu1 %v2803_v35 }
  0x78   :  { %2647 = vmatprep.mubr.bf16.mxu0 %v2804_v36  ;;  %2711 = vmatprep.mubr.bf16.mxu1 %v2805_v37 }
  0x7f   :  { %2648 = vmatmul.mubr.bf16.gmra.mrb[28].mxu0 %v2806_v38  ;;  %2712 = vmatmul.mubr.bf16.gmra.mrb[28].mxu1 %v2807_v39 }
  0x80   :  { %2651 = vmatprep.mubr.bf16.mxu0 %v2808_v40  ;;  %2715 = vmatprep.mubr.bf16.mxu1 %v2809_v41 }
  0x87   :  { %2652 = vmatmul.mubr.bf16.gmra.mrb[32].mxu0 %v2810_v42  ;;  %2716 = vmatmul.mubr.bf16.gmra.mrb[32].mxu1 %v2811_v43 }
  0x88   :  { %2655 = vmatprep.mubr.bf16.mxu0 %v2812_v44  ;;  %2719 = vmatprep.mubr.bf16.mxu1 %v2813_v45 }
  0x8f   :  { %2656 = vmatmul.mubr.bf16.gmra.mrb[36].mxu0 %v2814_v46  ;;  %2720 = vmatmul.mubr.bf16.gmra.mrb[36].mxu1 %v2815_v47 }
  0x90   :  { %2659 = vmatprep.mubr.bf16.mxu0 %v2816_v48  ;;  %2723 = vmatprep.mubr.bf16.mxu1 %v2817_v49 }
  0x97   :  { %2660 = vmatmul.mubr.bf16.gmra.mrb[40].mxu0 %v2818_v50  ;;  %2724 = vmatmul.mubr.bf16.gmra.mrb[40].mxu1 %v2819_v51 }
  0x98   :  { %2663 = vmatprep.mubr.bf16.mxu0 %v2820_v52  ;;  %2727 = vmatprep.mubr.bf16.mxu1 %v2821_v53 }
  0x9f   :  { %2664 = vmatmul.mubr.bf16.gmra.mrb[44].mxu0 %v2822_v54  ;;  %2728 = vmatmul.mubr.bf16.gmra.mrb[44].mxu1 %v2823_v55 }
  0xa0   :  { %2667 = vmatprep.mubr.bf16.mxu0 %v2824_v56  ;;  %2731 = vmatprep.mubr.bf16.mxu1 %v2825_v57 }
  0xa7   :  { %2668 = vmatmul.mubr.bf16.gmra.mrb[48].mxu0 %v2826_v58  ;;  %2732 = vmatmul.mubr.bf16.gmra.mrb[48].mxu1 %v2827_v59 }
  0xa8   :  { %2671 = vmatprep.mubr.bf16.mxu0 %v2828_v60  ;;  %2735 = vmatprep.mubr.bf16.mxu1 %v2829_v61 }
  0xaf   :  { %2672 = vmatmul.mubr.bf16.gmra.mrb[52].mxu0 %v2830_v62  ;;  %2736 = vmatmul.mubr.bf16.gmra.mrb[52].mxu1 %v2831_v63 }
  0xb0   :  { %2675 = vmatprep.mubr.bf16.mxu0 %v2832_v0  ;;  %2739 = vmatprep.mubr.bf16.mxu1 %v2833_v1 }
  0xb7   :  { %2676 = vmatmul.mubr.bf16.gmra.mrb[56].mxu0 %v2834_v2  ;;  %2740 = vmatmul.mubr.bf16.gmra.mrb[56].mxu1 %v2835_v3 }
  0xb8   :  { %2679 = vmatprep.mubr.bf16.mxu0 %v2836_v4  ;;  %2743 = vmatprep.mubr.bf16.mxu1 %v2837_v5 }
  0xbf   :  { %2680 = vmatmul.mubr.bf16.gmra.mrb[60].mxu0 %v2838_v6  ;;  %2744 = vmatmul.mubr.bf16.gmra.mrb[60].mxu1 %v2839_v7 }
 0x11a   :  { %v2621_v8 = vpop.f32.mrb[0].mxu0  ;;  %v2685_v9 = vpop.f32.mrb[0].mxu1 }
 0x11b   :  { %v651_v10 = vpop.f32.mrb[1].mxu0  ;;  %v907_v11 = vpop.f32.mrb[1].mxu1 }
 0x11c   :  { %v2622_v12 = vpop.f32.mrb[2].mxu0  ;;  %v2686_v13 = vpop.f32.mrb[2].mxu1 }
 0x11d   :  { %v2156_v14 = vpack.c.bf16 %v2622_v12, %v2621_v8  ;;  %v2316_v15 = vpack.c.bf16 %v2686_v13, %v2685_v9  ;;  %v654_v16 = vpop.f32.mrb[3].mxu0  ;;  %v910_v17 = vpop.f32.mrb[3].mxu1 }
 0x11e   :  { %v2151_v18 = vpack.c.bf16 %v654_v16, %v651_v10  ;;  %v2311_v19 = vpack.c.bf16 %v910_v17, %v907_v11 }
 0x11f   :  { %2468 = vst [vmem:[#allocation7 + $0x8] sm:$0xff] %v2156_v14   ;;  %2500 = vst [vmem:[#allocation7 + $0x108] sm:$0xff] %v2316_v15  }
 0x120   :  { %2152 = vst [vmem:[#allocation7] sm:$0xff] %v2151_v18   ;;  %2499 = vst [vmem:[#allocation7 + $0x100] sm:$0xff] %v2311_v19  }
 0x122   :  { %v2625_v20 = vpop.f32.mrb[4].mxu0  ;;  %v2689_v21 = vpop.f32.mrb[4].mxu1 }
 0x123   :  { %v667_v22 = vpop.f32.mrb[5].mxu0  ;;  %v923_v23 = vpop.f32.mrb[5].mxu1 }
 0x124   :  { %v2626_v24 = vpop.f32.mrb[6].mxu0  ;;  %v2690_v25 = vpop.f32.mrb[6].mxu1 }
 0x125   :  { %v2166_v26 = vpack.c.bf16 %v2626_v24, %v2625_v20  ;;  %v2326_v27 = vpack.c.bf16 %v2690_v25, %v2689_v21  ;;  %v670_v28 = vpop.f32.mrb[7].mxu0  ;;  %v926_v29 = vpop.f32.mrb[7].mxu1 }
 0x126   :  { %v2161_v30 = vpack.c.bf16 %v670_v28, %v667_v22  ;;  %v2321_v31 = vpack.c.bf16 %v926_v29, %v923_v23 }
 0x127   :  { %2470 = vst [vmem:[#allocation7 + $0x18] sm:$0xff] %v2166_v26   ;;  %2502 = vst [vmem:[#allocation7 + $0x118] sm:$0xff] %v2326_v27  }
 0x128   :  { %2469 = vst [vmem:[#allocation7 + $0x10] sm:$0xff] %v2161_v30   ;;  %2501 = vst [vmem:[#allocation7 + $0x110] sm:$0xff] %v2321_v31  }
 0x12a   :  { %v2629_v32 = vpop.f32.mrb[8].mxu0  ;;  %v2693_v33 = vpop.f32.mrb[8].mxu1 }
 0x12b   :  { %v683_v34 = vpop.f32.mrb[9].mxu0  ;;  %v939_v35 = vpop.f32.mrb[9].mxu1 }
 0x12c   :  { %v2630_v36 = vpop.f32.mrb[10].mxu0  ;;  %v2694_v37 = vpop.f32.mrb[10].mxu1 }
 0x12d   :  { %v2176_v38 = vpack.c.bf16 %v2630_v36, %v2629_v32  ;;  %v2336_v39 = vpack.c.bf16 %v2694_v37, %v2693_v33  ;;  %v686_v40 = vpop.f32.mrb[11].mxu0  ;;  %v942_v41 = vpop.f32.mrb[11].mxu1 }
 0x12e   :  { %v2171_v42 = vpack.c.bf16 %v686_v40, %v683_v34  ;;  %v2331_v43 = vpack.c.bf16 %v942_v41, %v939_v35 }
 0x12f   :  { %2472 = vst [vmem:[#allocation7 + $0x28] sm:$0xff] %v2176_v38   ;;  %2504 = vst [vmem:[#allocation7 + $0x128] sm:$0xff] %v2336_v39  }
 0x130   :  { %2471 = vst [vmem:[#allocation7 + $0x20] sm:$0xff] %v2171_v42   ;;  %2503 = vst [vmem:[#allocation7 + $0x120] sm:$0xff] %v2331_v43  }
 0x132   :  { %v2633_v44 = vpop.f32.mrb[12].mxu0  ;;  %v2697_v45 = vpop.f32.mrb[12].mxu1 }
 0x133   :  { %v699_v46 = vpop.f32.mrb[13].mxu0  ;;  %v955_v47 = vpop.f32.mrb[13].mxu1 }
 0x134   :  { %v2634_v48 = vpop.f32.mrb[14].mxu0  ;;  %v2698_v49 = vpop.f32.mrb[14].mxu1 }
 0x135   :  { %v2186_v50 = vpack.c.bf16 %v2634_v48, %v2633_v44  ;;  %v2346_v51 = vpack.c.bf16 %v2698_v49, %v2697_v45  ;;  %v702_v52 = vpop.f32.mrb[15].mxu0  ;;  %v958_v53 = vpop.f32.mrb[15].mxu1 }
 0x136   :  { %v2181_v54 = vpack.c.bf16 %v702_v52, %v699_v46  ;;  %v2341_v55 = vpack.c.bf16 %v958_v53, %v955_v47 }
 0x137   :  { %2474 = vst [vmem:[#allocation7 + $0x38] sm:$0xff] %v2186_v50   ;;  %2506 = vst [vmem:[#allocation7 + $0x138] sm:$0xff] %v2346_v51  }
 0x138   :  { %2473 = vst [vmem:[#allocation7 + $0x30] sm:$0xff] %v2181_v54   ;;  %2505 = vst [vmem:[#allocation7 + $0x130] sm:$0xff] %v2341_v55  }
 0x13a   :  { %v2637_v56 = vpop.f32.mrb[16].mxu0  ;;  %v2701_v57 = vpop.f32.mrb[16].mxu1 }
 0x13b   :  { %v715_v58 = vpop.f32.mrb[17].mxu0  ;;  %v971_v59 = vpop.f32.mrb[17].mxu1 }
 0x13c   :  { %v2638_v60 = vpop.f32.mrb[18].mxu0  ;;  %v2702_v61 = vpop.f32.mrb[18].mxu1 }
 0x13d   :  { %v2196_v62 = vpack.c.bf16 %v2638_v60, %v2637_v56  ;;  %v2356_v63 = vpack.c.bf16 %v2702_v61, %v2701_v57  ;;  %v718_v0 = vpop.f32.mrb[19].mxu0  ;;  %v974_v1 = vpop.f32.mrb[19].mxu1 }
 0x13e   :  { %v2191_v2 = vpack.c.bf16 %v718_v0, %v715_v58  ;;  %v2351_v3 = vpack.c.bf16 %v974_v1, %v971_v59 }
 0x13f   :  { %2476 = vst [vmem:[#allocation7 + $0x48] sm:$0xff] %v2196_v62   ;;  %2508 = vst [vmem:[#allocation7 + $0x148] sm:$0xff] %v2356_v63  }
 0x140   :  { %2475 = vst [vmem:[#allocation7 + $0x40] sm:$0xff] %v2191_v2   ;;  %2507 = vst [vmem:[#allocation7 + $0x140] sm:$0xff] %v2351_v3  }
 0x142   :  { %v2641_v4 = vpop.f32.mrb[20].mxu0  ;;  %v2705_v5 = vpop.f32.mrb[20].mxu1 }
 0x143   :  { %v731_v6 = vpop.f32.mrb[21].mxu0  ;;  %v987_v7 = vpop.f32.mrb[21].mxu1 }
 0x144   :  { %v2642_v8 = vpop.f32.mrb[22].mxu0  ;;  %v2706_v9 = vpop.f32.mrb[22].mxu1 }
 0x145   :  { %v2206_v10 = vpack.c.bf16 %v2642_v8, %v2641_v4  ;;  %v2366_v11 = vpack.c.bf16 %v2706_v9, %v2705_v5  ;;  %v734_v12 = vpop.f32.mrb[23].mxu0  ;;  %v990_v13 = vpop.f32.mrb[23].mxu1 }
 0x146   :  { %v2201_v14 = vpack.c.bf16 %v734_v12, %v731_v6  ;;  %v2361_v15 = vpack.c.bf16 %v990_v13, %v987_v7 }
 0x147   :  { %2478 = vst [vmem:[#allocation7 + $0x58] sm:$0xff] %v2206_v10   ;;  %2510 = vst [vmem:[#allocation7 + $0x158] sm:$0xff] %v2366_v11  }
 0x148   :  { %2477 = vst [vmem:[#allocation7 + $0x50] sm:$0xff] %v2201_v14   ;;  %2509 = vst [vmem:[#allocation7 + $0x150] sm:$0xff] %v2361_v15  }
 0x14a   :  { %v2645_v16 = vpop.f32.mrb[24].mxu0  ;;  %v2709_v17 = vpop.f32.mrb[24].mxu1 }
 0x14b   :  { %v747_v18 = vpop.f32.mrb[25].mxu0  ;;  %v1003_v19 = vpop.f32.mrb[25].mxu1 }
 0x14c   :  { %v2646_v20 = vpop.f32.mrb[26].mxu0  ;;  %v2710_v21 = vpop.f32.mrb[26].mxu1 }
 0x14d   :  { %v2216_v22 = vpack.c.bf16 %v2646_v20, %v2645_v16  ;;  %v2376_v23 = vpack.c.bf16 %v2710_v21, %v2709_v17  ;;  %v750_v24 = vpop.f32.mrb[27].mxu0  ;;  %v1006_v25 = vpop.f32.mrb[27].mxu1 }
 0x14e   :  { %v2211_v26 = vpack.c.bf16 %v750_v24, %v747_v18  ;;  %v2371_v27 = vpack.c.bf16 %v1006_v25, %v1003_v19 }
 0x14f   :  { %2480 = vst [vmem:[#allocation7 + $0x68] sm:$0xff] %v2216_v22   ;;  %2512 = vst [vmem:[#allocation7 + $0x168] sm:$0xff] %v2376_v23  }
 0x150   :  { %2479 = vst [vmem:[#allocation7 + $0x60] sm:$0xff] %v2211_v26   ;;  %2511 = vst [vmem:[#allocation7 + $0x160] sm:$0xff] %v2371_v27  }
 0x152   :  { %v2649_v28 = vpop.f32.mrb[28].mxu0  ;;  %v2713_v29 = vpop.f32.mrb[28].mxu1 }
 0x153   :  { %v763_v30 = vpop.f32.mrb[29].mxu0  ;;  %v1019_v31 = vpop.f32.mrb[29].mxu1 }
 0x154   :  { %v2650_v32 = vpop.f32.mrb[30].mxu0  ;;  %v2714_v33 = vpop.f32.mrb[30].mxu1 }
 0x155   :  { %v2226_v34 = vpack.c.bf16 %v2650_v32, %v2649_v28  ;;  %v2386_v35 = vpack.c.bf16 %v2714_v33, %v2713_v29  ;;  %v766_v36 = vpop.f32.mrb[31].mxu0  ;;  %v1022_v37 = vpop.f32.mrb[31].mxu1 }
 0x156   :  { %v2221_v38 = vpack.c.bf16 %v766_v36, %v763_v30  ;;  %v2381_v39 = vpack.c.bf16 %v1022_v37, %v1019_v31 }
 0x157   :  { %2482 = vst [vmem:[#allocation7 + $0x78] sm:$0xff] %v2226_v34   ;;  %2514 = vst [vmem:[#allocation7 + $0x178] sm:$0xff] %v2386_v35  }
 0x158   :  { %2481 = vst [vmem:[#allocation7 + $0x70] sm:$0xff] %v2221_v38   ;;  %2513 = vst [vmem:[#allocation7 + $0x170] sm:$0xff] %v2381_v39  }
 0x15a   :  { %v2653_v40 = vpop.f32.mrb[32].mxu0  ;;  %v2717_v41 = vpop.f32.mrb[32].mxu1 }
 0x15b   :  { %v779_v42 = vpop.f32.mrb[33].mxu0  ;;  %v1035_v43 = vpop.f32.mrb[33].mxu1 }
 0x15c   :  { %v2654_v44 = vpop.f32.mrb[34].mxu0  ;;  %v2718_v45 = vpop.f32.mrb[34].mxu1 }
 0x15d   :  { %v2236_v46 = vpack.c.bf16 %v2654_v44, %v2653_v40  ;;  %v2396_v47 = vpack.c.bf16 %v2718_v45, %v2717_v41  ;;  %v782_v48 = vpop.f32.mrb[35].mxu0  ;;  %v1038_v49 = vpop.f32.mrb[35].mxu1 }
 0x15e   :  { %v2231_v50 = vpack.c.bf16 %v782_v48, %v779_v42  ;;  %v2391_v51 = vpack.c.bf16 %v1038_v49, %v1035_v43 }
 0x15f   :  { %2484 = vst [vmem:[#allocation7 + $0x88] sm:$0xff] %v2236_v46   ;;  %2516 = vst [vmem:[#allocation7 + $0x188] sm:$0xff] %v2396_v47  }
 0x160   :  { %2483 = vst [vmem:[#allocation7 + $0x80] sm:$0xff] %v2231_v50   ;;  %2515 = vst [vmem:[#allocation7 + $0x180] sm:$0xff] %v2391_v51  }
 0x162   :  { %v2657_v52 = vpop.f32.mrb[36].mxu0  ;;  %v2721_v53 = vpop.f32.mrb[36].mxu1 }
 0x163   :  { %v795_v54 = vpop.f32.mrb[37].mxu0  ;;  %v1051_v55 = vpop.f32.mrb[37].mxu1 }
 0x164   :  { %v2658_v56 = vpop.f32.mrb[38].mxu0  ;;  %v2722_v57 = vpop.f32.mrb[38].mxu1 }
 0x165   :  { %v2246_v58 = vpack.c.bf16 %v2658_v56, %v2657_v52  ;;  %v2406_v59 = vpack.c.bf16 %v2722_v57, %v2721_v53  ;;  %v798_v60 = vpop.f32.mrb[39].mxu0  ;;  %v1054_v61 = vpop.f32.mrb[39].mxu1 }
 0x166   :  { %v2241_v62 = vpack.c.bf16 %v798_v60, %v795_v54  ;;  %v2401_v63 = vpack.c.bf16 %v1054_v61, %v1051_v55 }
 0x167   :  { %2486 = vst [vmem:[#allocation7 + $0x98] sm:$0xff] %v2246_v58   ;;  %2518 = vst [vmem:[#allocation7 + $0x198] sm:$0xff] %v2406_v59  }
 0x168   :  { %2485 = vst [vmem:[#allocation7 + $0x90] sm:$0xff] %v2241_v62   ;;  %2517 = vst [vmem:[#allocation7 + $0x190] sm:$0xff] %v2401_v63  }
 0x16a   :  { %v2661_v0 = vpop.f32.mrb[40].mxu0  ;;  %v2725_v1 = vpop.f32.mrb[40].mxu1 }
 0x16b   :  { %v811_v2 = vpop.f32.mrb[41].mxu0  ;;  %v1067_v3 = vpop.f32.mrb[41].mxu1 }
 0x16c   :  { %v2662_v4 = vpop.f32.mrb[42].mxu0  ;;  %v2726_v5 = vpop.f32.mrb[42].mxu1 }
 0x16d   :  { %v2256_v6 = vpack.c.bf16 %v2662_v4, %v2661_v0  ;;  %v2416_v7 = vpack.c.bf16 %v2726_v5, %v2725_v1  ;;  %v814_v8 = vpop.f32.mrb[43].mxu0  ;;  %v1070_v9 = vpop.f32.mrb[43].mxu1 }
 0x16e   :  { %v2251_v10 = vpack.c.bf16 %v814_v8, %v811_v2  ;;  %v2411_v11 = vpack.c.bf16 %v1070_v9, %v1067_v3 }
 0x16f   :  { %2488 = vst [vmem:[#allocation7 + $0xa8] sm:$0xff] %v2256_v6   ;;  %2520 = vst [vmem:[#allocation7 + $0x1a8] sm:$0xff] %v2416_v7  }
 0x170   :  { %2487 = vst [vmem:[#allocation7 + $0xa0] sm:$0xff] %v2251_v10   ;;  %2519 = vst [vmem:[#allocation7 + $0x1a0] sm:$0xff] %v2411_v11  }
 0x172   :  { %v2665_v12 = vpop.f32.mrb[44].mxu0  ;;  %v2729_v13 = vpop.f32.mrb[44].mxu1 }
 0x173   :  { %v827_v14 = vpop.f32.mrb[45].mxu0  ;;  %v1083_v15 = vpop.f32.mrb[45].mxu1 }
 0x174   :  { %v2666_v16 = vpop.f32.mrb[46].mxu0  ;;  %v2730_v17 = vpop.f32.mrb[46].mxu1 }
 0x175   :  { %v2266_v18 = vpack.c.bf16 %v2666_v16, %v2665_v12  ;;  %v2426_v19 = vpack.c.bf16 %v2730_v17, %v2729_v13  ;;  %v830_v20 = vpop.f32.mrb[47].mxu0  ;;  %v1086_v21 = vpop.f32.mrb[47].mxu1 }
 0x176   :  { %v2261_v22 = vpack.c.bf16 %v830_v20, %v827_v14  ;;  %v2421_v23 = vpack.c.bf16 %v1086_v21, %v1083_v15 }
 0x177   :  { %2490 = vst [vmem:[#allocation7 + $0xb8] sm:$0xff] %v2266_v18   ;;  %2522 = vst [vmem:[#allocation7 + $0x1b8] sm:$0xff] %v2426_v19  }
 0x178   :  { %2489 = vst [vmem:[#allocation7 + $0xb0] sm:$0xff] %v2261_v22   ;;  %2521 = vst [vmem:[#allocation7 + $0x1b0] sm:$0xff] %v2421_v23  }
 0x17a   :  { %v2669_v24 = vpop.f32.mrb[48].mxu0  ;;  %v2733_v25 = vpop.f32.mrb[48].mxu1 }
 0x17b   :  { %v843_v26 = vpop.f32.mrb[49].mxu0  ;;  %v1099_v27 = vpop.f32.mrb[49].mxu1 }
 0x17c   :  { %v2670_v28 = vpop.f32.mrb[50].mxu0  ;;  %v2734_v29 = vpop.f32.mrb[50].mxu1 }
 0x17d   :  { %v2276_v30 = vpack.c.bf16 %v2670_v28, %v2669_v24  ;;  %v2436_v31 = vpack.c.bf16 %v2734_v29, %v2733_v25  ;;  %v846_v32 = vpop.f32.mrb[51].mxu0  ;;  %v1102_v33 = vpop.f32.mrb[51].mxu1 }
 0x17e   :  { %v2271_v34 = vpack.c.bf16 %v846_v32, %v843_v26  ;;  %v2431_v35 = vpack.c.bf16 %v1102_v33, %v1099_v27 }
 0x17f   :  { %2492 = vst [vmem:[#allocation7 + $0xc8] sm:$0xff] %v2276_v30   ;;  %2524 = vst [vmem:[#allocation7 + $0x1c8] sm:$0xff] %v2436_v31  }
 0x180   :  { %2491 = vst [vmem:[#allocation7 + $0xc0] sm:$0xff] %v2271_v34   ;;  %2523 = vst [vmem:[#allocation7 + $0x1c0] sm:$0xff] %v2431_v35  }
 0x182   :  { %v2673_v36 = vpop.f32.mrb[52].mxu0  ;;  %v2737_v37 = vpop.f32.mrb[52].mxu1 }
 0x183   :  { %v859_v38 = vpop.f32.mrb[53].mxu0  ;;  %v1115_v39 = vpop.f32.mrb[53].mxu1 }
 0x184   :  { %v2674_v40 = vpop.f32.mrb[54].mxu0  ;;  %v2738_v41 = vpop.f32.mrb[54].mxu1 }
 0x185   :  { %v2286_v42 = vpack.c.bf16 %v2674_v40, %v2673_v36  ;;  %v2446_v43 = vpack.c.bf16 %v2738_v41, %v2737_v37  ;;  %v862_v44 = vpop.f32.mrb[55].mxu0  ;;  %v1118_v45 = vpop.f32.mrb[55].mxu1 }
 0x186   :  { %v2281_v46 = vpack.c.bf16 %v862_v44, %v859_v38  ;;  %v2441_v47 = vpack.c.bf16 %v1118_v45, %v1115_v39 }
 0x187   :  { %2494 = vst [vmem:[#allocation7 + $0xd8] sm:$0xff] %v2286_v42   ;;  %2526 = vst [vmem:[#allocation7 + $0x1d8] sm:$0xff] %v2446_v43  }
 0x188   :  { %2493 = vst [vmem:[#allocation7 + $0xd0] sm:$0xff] %v2281_v46   ;;  %2525 = vst [vmem:[#allocation7 + $0x1d0] sm:$0xff] %v2441_v47  }
 0x18a   :  { %v2677_v48 = vpop.f32.mrb[56].mxu0  ;;  %v2741_v49 = vpop.f32.mrb[56].mxu1 }
 0x18b   :  { %v875_v50 = vpop.f32.mrb[57].mxu0  ;;  %v1131_v51 = vpop.f32.mrb[57].mxu1 }
 0x18c   :  { %v2678_v52 = vpop.f32.mrb[58].mxu0  ;;  %v2742_v53 = vpop.f32.mrb[58].mxu1 }
 0x18d   :  { %v2296_v54 = vpack.c.bf16 %v2678_v52, %v2677_v48  ;;  %v2456_v55 = vpack.c.bf16 %v2742_v53, %v2741_v49  ;;  %v878_v56 = vpop.f32.mrb[59].mxu0  ;;  %v1134_v57 = vpop.f32.mrb[59].mxu1 }
 0x18e   :  { %v2291_v58 = vpack.c.bf16 %v878_v56, %v875_v50  ;;  %v2451_v59 = vpack.c.bf16 %v1134_v57, %v1131_v51 }
 0x18f   :  { %2496 = vst [vmem:[#allocation7 + $0xe8] sm:$0xff] %v2296_v54   ;;  %2528 = vst [vmem:[#allocation7 + $0x1e8] sm:$0xff] %v2456_v55  }
 0x190   :  { %2495 = vst [vmem:[#allocation7 + $0xe0] sm:$0xff] %v2291_v58   ;;  %2527 = vst [vmem:[#allocation7 + $0x1e0] sm:$0xff] %v2451_v59  }
 0x192   :  { %v2681_v60 = vpop.f32.mrb[60].mxu0  ;;  %v2745_v61 = vpop.f32.mrb[60].mxu1 }
 0x193   :  { %v891_v62 = vpop.f32.mrb[61].mxu0  ;;  %v1147_v63 = vpop.f32.mrb[61].mxu1 }
 0x194   :  { %v2682_v0 = vpop.f32.mrb[62].mxu0  ;;  %v2746_v1 = vpop.f32.mrb[62].mxu1 }
 0x195   :  { %v2306_v2 = vpack.c.bf16 %v2682_v0, %v2681_v60  ;;  %v2466_v3 = vpack.c.bf16 %v2746_v1, %v2745_v61  ;;  %v894_v4 = vpop.f32.mrb[63].mxu0  ;;  %v1150_v5 = vpop.f32.mrb[63].mxu1 }
 0x196   :  { %v2301_v6 = vpack.c.bf16 %v894_v4, %v891_v62  ;;  %v2461_v7 = vpack.c.bf16 %v1150_v5, %v1147_v63 }
 0x197   :  { %2498 = vst [vmem:[#allocation7 + $0xf8] sm:$0xff] %v2306_v2   ;;  %2530 = vst [vmem:[#allocation7 + $0x1f8] sm:$0xff] %v2466_v3  }
 0x198   :  { %2497 = vst [vmem:[#allocation7 + $0xf0] sm:$0xff] %v2301_v6   ;;  %2529 = vst [vmem:[#allocation7 + $0x1f0] sm:$0xff] %v2461_v7  }
 0x199   :  { %2895 = shalt.err (!%p2892_p6)
}
 0x19a   :  { %s2896_s10 = scalar_lea.hbm %s2979_s2, 8192 }
 0x19b   :  { %p2897_p7 = scmp.ne.s32.totalorder %s2979_s2, %s2896_s10  ;;  %p2900_p8 = scmp.lt.u32.totalorder %s2896_s10, %s2979_s2 }
 0x19d   :  { %p2902_p9 = pnand %p2900_p8, %p2897_p7 }
 0x19f   :  { %2905 = shalt.err (!%p2902_p9)
}
 0x1a0   :  { %1813 = dma.vmem_to_hbm [thread:$0]  %s1808_s6, 8192, %s2979_s2, [#allocation4], %s2913_s19, %s2913_s19, %s2914_s20  }
 0x1a1   :  { %2910 = dma.done.wait [#allocation4], 8192  }
 0x1a2   :  { %2911 = vsyncadd [#allocation4], 4294959104 }
 0x1a3   :  { %1817 = vsyncpa [#allocation3], 1 }
 0x1a4   :  { %1818 = vsyncpa [#allocation6], 1 }
 0x1a5   :  { %1819 = vsyncpa [#allocation4], 1 }

</bundles_post_ra>
